<compile_context>
chip_gen: v5e
topology: v5e:2x2
jax: 0.10.0
libtpu: 0.0.40
codegen_flags: <defaults>
</compile_context>

<pallas_src>
import jax
import jax.numpy as jnp
from jax.experimental import pallas as pl
from jax.experimental.pallas import tpu as pltpu


def _round_up(x, m):
    return ((x + m - 1) // m) * m


def _vmem_capacity_bytes(default=64 * 2**20):
    """Per-core VMEM capacity; conservative 64 MiB (v7x) fallback."""
    try:
        return int(pltpu.get_tpu_info().vmem_capacity_bytes)
    except Exception:
        return default


def ffnn_kernel(x_ref, w1_ref, b1_ref, w2_ref, b2_ref, out_ref):
    # x:  (TB, D)  native dtype (f32)      w1: (D, Hp)  compute dtype
    # b1: (1, Hp)  f32                     w2: (Hp, Cp) compute dtype
    # b2: (1, Cp)  f32 (-1e30 in padded class lanes)
    # out:(TB, Cp) output dtype
    x = x_ref[...].astype(w1_ref.dtype)   # f32->bf16 cast hides under DMA/MXU slots

    # Layer 1 on the MXU with f32 accumulation; bias add + ReLU in f32 (VPU).
    h1 = jnp.dot(x, w1_ref[...], preferred_element_type=jnp.float32) + b1_ref[...]
    h1 = jnp.maximum(h1, 0.0)

    # Layer 2: MXU-dtype activations, f32 accumulation.
    logits = jnp.dot(h1.astype(w2_ref.dtype), w2_ref[...],
                     preferred_element_type=jnp.float32) + b2_ref[...]

    # Numerically stable log-softmax over the lane-dense (128-padded) class axis.
    # Padded classes carry logits ~ -1e30, so they affect neither max nor sum.
    # (With a bf16 output those lanes round to -inf — harmless, sliced off.)
    m = jnp.max(logits, axis=-1, keepdims=True)
    shifted = logits - m
    lse = jnp.log(jnp.sum(jnp.exp(shifted), axis=-1, keepdims=True))
    out_ref[...] = (shifted - lse).astype(out_ref.dtype)


def prepare_ffnn_params(w1, b1, w2, b2, compute_dtype=jnp.bfloat16):
    """One-time weight prep: transpose to (in, out) and pad H/C to 128 lanes.

    w1: (H, D) PyTorch layout, b1: (H,), w2: (C, H), b2: (C,).
    D is left unpadded (x streams in its native layout).  Zero-padding H and
    adding zero weight columns for padded classes is semantics-preserving; the
    padded class biases are -1e30 so the log-softmax normalization ignores them.
    """
    H, D = w1.shape
    C = w2.shape[0]
    Hp = _round_up(H, 128)
    Cp = _round_up(C, 128)

    w1_t = jnp.zeros((D, Hp), compute_dtype).at[:, :H].set(w1.T.astype(compute_dtype))
    b1_p = jnp.zeros((1, Hp), jnp.float32).at[0, :H].set(b1.astype(jnp.float32))
    w2_t = jnp.zeros((Hp, Cp), compute_dtype).at[:H, :C].set(w2.T.astype(compute_dtype))
    b2_p = jnp.full((1, Cp), -1e30, jnp.float32).at[0, :C].set(b2.astype(jnp.float32))

    return {
        "w1": w1_t, "b1": b1_p, "w2": w2_t, "b2": b2_p,
        "dims": (D, H, C, Hp, Cp),
        "compute_dtype": compute_dtype,
    }


def _pick_batch_tile(B, vmem_cap):
    """Batch tile: multiple of 8 sublanes; larger tiles on 128-MiB-VMEM parts
    (v5e/v6e); >= 2 grid steps when the batch allows so v7x megacore splits."""
    tb_max = 512 if vmem_cap >= 96 * 2**20 else 256
    b8 = _round_up(max(B, 1), 8)
    if b8 <= 16:
        return b8                                  # too small to split across cores
    return min(tb_max, _round_up(pl.cdiv(b8, 2), 8))


def ffnn_forward(x, params, *, out_dtype=None):
    """x: (B, D). Returns (B, C) log-probabilities (dtype = out_dtype or x.dtype)."""
    D, H, C, Hp, Cp = params["dims"]
    cdt = params["compute_dtype"]
    B = x.shape[0]
    assert x.shape[1] == D, f"expected input dim {D}, got {x.shape[1]}"
    out_dtype = x.dtype if out_dtype is None else out_dtype

    vmem_cap = _vmem_capacity_bytes()
    TB = _pick_batch_tile(B, vmem_cap)
    grid = (pl.cdiv(B, TB),)

    x_size = jnp.dtype(x.dtype).itemsize
    w_size = jnp.dtype(cdt).itemsize
    o_size = jnp.dtype(out_dtype).itemsize
    weight_bytes = (D * Hp + Hp * Cp) * w_size + (Hp + Cp) * 4
    if weight_bytes > 0.7 * vmem_cap:
        # TODO(synk): switch to the K/N-tiled weight path (P3 accumulator) here;
        # the weight-stationary design breaks at ~half the model size on v7x.
        pass

    def build(single_buffer_weights):
        w_kw = {"pipeline_mode": pl.Buffered(1)} if single_buffer_weights else {}
        weight_mult = 1 if single_buffer_weights else 2
        io_bytes = TB * D * x_size + TB * Cp * o_size        # one buffer of x + out
        interm_bytes = 4 * TB * (Hp + Cp) * 4                # f32 h1/logits headroom
        vmem_needed = weight_mult * weight_bytes + 2 * io_bytes + interm_bytes
        vmem_limit = int(min(int(0.75 * vmem_cap),
                             max(int(1.25 * vmem_needed), 16 * 2**20)))
        cost = pl.CostEstimate(
            flops=2 * B * (D * H + H * C),
            transcendentals=B * (C + 1),            # exp per class + log per row
            bytes_accessed=B * D * x_size + weight_bytes + B * Cp * o_size,
        )
        return pl.pallas_call(
            ffnn_kernel,
            out_shape=jax.ShapeDtypeStruct((B, Cp), out_dtype),
            grid=grid,
            in_specs=[
                pl.BlockSpec((TB, D), lambda i: (i, 0)),           # x tile, native f32
                pl.BlockSpec((D, Hp), lambda i: (0, 0), **w_kw),   # W1 resident
                pl.BlockSpec((1, Hp), lambda i: (0, 0), **w_kw),   # b1 resident
                pl.BlockSpec((Hp, Cp), lambda i: (0, 0), **w_kw),  # W2 resident
                pl.BlockSpec((1, Cp), lambda i: (0, 0), **w_kw),   # b2 resident
            ],
            out_specs=pl.BlockSpec((TB, Cp), lambda i: (i, 0)),    # lane-dense stores
            compiler_params=pltpu.CompilerParams(
                dimension_semantics=("parallel",),   # v7x megacore; neutral elsewhere
                vmem_limit_bytes=vmem_limit,
            ),
            cost_estimate=cost,
        )

    args = (x, params["w1"], params["b1"], params["w2"], params["b2"])
    try:
        out = build(single_buffer_weights=True)(*args)
    except Exception:
        # Installed JAX without BlockSpec.pipeline_mode / Buffered(1) support:
        # fall back to default double-buffered (still DMA-once) resident weights.
        out = build(single_buffer_weights=False)(*args)

    # Only the padded class lanes need trimming (batch is never padded). Consumers
    # that accept the (B, 128) padded layout can skip this slice entirely.
    return out[:, :C]


def init_ffnn_params(key, input_dim, h, output_dim=5):
    """Deterministic init mimicking nn.Linear default (Kaiming-uniform-ish)."""
    k1, k2, k3, k4 = jax.random.split(key, 4)
    bound1 = 1.0 / jnp.sqrt(input_dim)
    bound2 = 1.0 / jnp.sqrt(h)
    w1 = jax.random.uniform(k1, (h, input_dim), jnp.float32, -bound1, bound1)
    b1 = jax.random.uniform(k2, (h,), jnp.float32, -bound1, bound1)
    w2 = jax.random.uniform(k3, (output_dim, h), jnp.float32, -bound2, bound2)
    b2 = jax.random.uniform(k4, (output_dim,), jnp.float32, -bound2, bound2)
    return w1, b1, w2, b2


if __name__ == "__main__":
    key = jax.random.PRNGKey(0)
    k_x, k_p = jax.random.split(key)

    batch, input_dim, hidden = 8, 32, 32
    x = jax.random.normal(k_x, (batch, input_dim), jnp.float32)
    w1, b1, w2, b2 = init_ffnn_params(k_p, input_dim, hidden, output_dim=5)

    # Pure-JAX f32 reference (matches the PyTorch module's forward).
    ref = jax.nn.log_softmax(jnp.maximum(x @ w1.T + b1, 0.0) @ w2.T + b2, axis=-1)

    # Exactness check with f32 compute (padding must be semantics-preserving).
    params_f32 = prepare_ffnn_params(w1, b1, w2, b2, compute_dtype=jnp.float32)
    out_f32 = ffnn_forward(x, params_f32)                  # f32 output (module default)
    jax.block_until_ready(out_f32)
    assert out_f32.shape == ref.shape and out_f32.dtype == ref.dtype
    assert jnp.allclose(out_f32, ref, atol=1e-5, rtol=1e-5), "f32 mismatch vs reference"

    # Fast path: bf16 MXU operands + bf16 output stream, f32 accumulation/softmax.
    params_bf16 = prepare_ffnn_params(w1, b1, w2, b2, compute_dtype=jnp.bfloat16)
    out_bf16 = ffnn_forward(x, params_bf16, out_dtype=jnp.bfloat16)
    jax.block_until_ready(out_bf16)
    assert out_bf16.shape == ref.shape
    assert jnp.allclose(out_bf16.astype(jnp.float32), ref, atol=3e-2, rtol=3e-2), \
        "bf16 mismatch vs reference"

    print("KERNEL_OK")
</pallas_src>

<mosaic_0001>
module attributes {stable_mosaic.version = 11 : i64} {
  func.func @ffnn_kernel(%arg0: i32, %arg1: memref<8x32xf32, #tpu.memory_space<vmem>>, %arg2: memref<32x128xf32, #tpu.memory_space<vmem>>, %arg3: memref<1x128xf32, #tpu.memory_space<vmem>>, %arg4: memref<128x128xf32, #tpu.memory_space<vmem>>, %arg5: memref<1x128xf32, #tpu.memory_space<vmem>>, %arg6: memref<8x128xf32, #tpu.memory_space<vmem>>) attributes {dimension_semantics = [#tpu.dimension_semantics<parallel>], iteration_bounds = array<i64: 1>, scalar_prefetch = 0 : i64, scratch_operands = 0 : i64, tpu.core_type = #tpu.core_type<tc>, window_params = [{transform_indices = @transform_0, window_bounds = array<i64: 8, 32>}, {pipeline_mode = #tpu.pipeline_mode<synchronous>, transform_indices = @transform_1, window_bounds = array<i64: 32, 128>}, {pipeline_mode = #tpu.pipeline_mode<synchronous>, transform_indices = @transform_2, window_bounds = array<i64: 1, 128>}, {pipeline_mode = #tpu.pipeline_mode<synchronous>, transform_indices = @transform_3, window_bounds = array<i64: 128, 128>}, {pipeline_mode = #tpu.pipeline_mode<synchronous>, transform_indices = @transform_4, window_bounds = array<i64: 1, 128>}, {transform_indices = @transform_5, window_bounds = array<i64: 8, 128>}]} {
    %c0 = arith.constant 0 : index
    %c0_0 = arith.constant 0 : index
    %0 = vector.load %arg1[%c0, %c0_0] : memref<8x32xf32, #tpu.memory_space<vmem>>, vector<8x32xf32>
    %c0_1 = arith.constant 0 : index
    %c0_2 = arith.constant 0 : index
    %1 = vector.load %arg2[%c0_1, %c0_2] : memref<32x128xf32, #tpu.memory_space<vmem>>, vector<32x128xf32>
    %cst = arith.constant dense<0.000000e+00> : vector<8x128xf32>
    %2 = tpu.matmul %0, %1, %cst {dimension_numbers = #tpu.dot_dimension_numbers<[1], [0], [0], [1], [0, 0, 1, 1], [], []>} : vector<8x32xf32>, vector<32x128xf32>, vector<8x128xf32> -> vector<8x128xf32>
    %c0_3 = arith.constant 0 : index
    %c0_4 = arith.constant 0 : index
    %3 = vector.load %arg3[%c0_3, %c0_4] : memref<1x128xf32, #tpu.memory_space<vmem>>, vector<1x128xf32>
    %4 = vector.broadcast %3 : vector<1x128xf32> to vector<8x128xf32>
    %5 = arith.addf %2, %4 : vector<8x128xf32>
    %cst_5 = arith.constant 0.000000e+00 : f32
    %6 = vector.broadcast %cst_5 : f32 to vector<8x128xf32>
    %7 = arith.maximumf %5, %6 : vector<8x128xf32>
    %c0_6 = arith.constant 0 : index
    %c0_7 = arith.constant 0 : index
    %8 = vector.load %arg4[%c0_6, %c0_7] : memref<128x128xf32, #tpu.memory_space<vmem>>, vector<128x128xf32>
    %cst_8 = arith.constant dense<0.000000e+00> : vector<8x128xf32>
    %9 = tpu.matmul %7, %8, %cst_8 {dimension_numbers = #tpu.dot_dimension_numbers<[1], [0], [0], [1], [0, 0, 1, 1], [], []>} : vector<8x128xf32>, vector<128x128xf32>, vector<8x128xf32> -> vector<8x128xf32>
    %c0_9 = arith.constant 0 : index
    %c0_10 = arith.constant 0 : index
    %10 = vector.load %arg5[%c0_9, %c0_10] : memref<1x128xf32, #tpu.memory_space<vmem>>, vector<1x128xf32>
    %11 = vector.broadcast %10 : vector<1x128xf32> to vector<8x128xf32>
    %12 = arith.addf %9, %11 : vector<8x128xf32>
    %cst_11 = arith.constant dense<0xFF800000> : vector<8xf32>
    %13 = vector.multi_reduction <maximumf>, %12, %cst_11 [1] : vector<8x128xf32> to vector<8xf32>
    %14 = vector.shape_cast %13 : vector<8xf32> to vector<8x1xf32>
    %15 = vector.broadcast %14 : vector<8x1xf32> to vector<8x128xf32>
    %16 = arith.subf %12, %15 : vector<8x128xf32>
    %17 = math.exp %16 : vector<8x128xf32>
    %cst_12 = arith.constant dense<0.000000e+00> : vector<8xf32>
    %18 = vector.multi_reduction <add>, %17, %cst_12 [1] : vector<8x128xf32> to vector<8xf32>
    %19 = vector.shape_cast %18 : vector<8xf32> to vector<8x1xf32>
    %20 = math.log %19 : vector<8x1xf32>
    %21 = vector.broadcast %20 : vector<8x1xf32> to vector<8x128xf32>
    %22 = arith.subf %16, %21 : vector<8x128xf32>
    %c0_13 = arith.constant 0 : index
    %c0_14 = arith.constant 0 : index
    %23 = vector.load %arg6[%c0_13, %c0_14] : memref<8x128xf32, #tpu.memory_space<vmem>>, vector<8x128xf32>
    tpu.vector_store %arg6[%c0_13, %c0_14], %22 {strides = array<i32>} : memref<8x128xf32, #tpu.memory_space<vmem>>, vector<8x128xf32>,
    return
  }
  func.func @transform_0(%arg0: i32) -> (i32, i32) {
    %c0_i32 = arith.constant 0 : i32
    %c0_i32_0 = arith.constant 0 : i32
    return %arg0, %c0_i32 : i32, i32
  }
  func.func @transform_1(%arg0: i32) -> (i32, i32) {
    %c0_i32 = arith.constant 0 : i32
    %c0_i32_0 = arith.constant 0 : i32
    %c0_i32_1 = arith.constant 0 : i32
    return %c0_i32, %c0_i32_0 : i32, i32
  }
  func.func @transform_2(%arg0: i32) -> (i32, i32) {
    %c0_i32 = arith.constant 0 : i32
    %c0_i32_0 = arith.constant 0 : i32
    %c0_i32_1 = arith.constant 0 : i32
    return %c0_i32, %c0_i32_0 : i32, i32
  }
  func.func @transform_3(%arg0: i32) -> (i32, i32) {
    %c0_i32 = arith.constant 0 : i32
    %c0_i32_0 = arith.constant 0 : i32
    %c0_i32_1 = arith.constant 0 : i32
    return %c0_i32, %c0_i32_0 : i32, i32
  }
  func.func @transform_4(%arg0: i32) -> (i32, i32) {
    %c0_i32 = arith.constant 0 : i32
    %c0_i32_0 = arith.constant 0 : i32
    %c0_i32_1 = arith.constant 0 : i32
    return %c0_i32, %c0_i32_0 : i32, i32
  }
  func.func @transform_5(%arg0: i32) -> (i32, i32) {
    %c0_i32 = arith.constant 0 : i32
    %c0_i32_0 = arith.constant 0 : i32
    return %arg0, %c0_i32 : i32, i32
  }
}

module attributes {stable_mosaic.version = 11 : i64} {
  func.func @ffnn_kernel(%arg0: i32, %arg1: memref<8x32xf32, #tpu.memory_space<vmem>>, %arg2: memref<32x128xf32, #tpu.memory_space<vmem>>, %arg3: memref<1x128xf32, #tpu.memory_space<vmem>>, %arg4: memref<128x128xf32, #tpu.memory_space<vmem>>, %arg5: memref<1x128xf32, #tpu.memory_space<vmem>>, %arg6: memref<8x128xf32, #tpu.memory_space<vmem>>) attributes {dimension_semantics = [#tpu.dimension_semantics<parallel>], iteration_bounds = array<i64: 1>, scalar_prefetch = 0 : i64, scratch_operands = 0 : i64, tpu.core_type = #tpu.core_type<tc>, window_params = [{transform_indices = @transform_0, window_bounds = array<i64: 8, 32>}, {pipeline_mode = #tpu.pipeline_mode<synchronous>, transform_indices = @transform_1, window_bounds = array<i64: 32, 128>}, {pipeline_mode = #tpu.pipeline_mode<synchronous>, transform_indices = @transform_2, window_bounds = array<i64: 1, 128>}, {pipeline_mode = #tpu.pipeline_mode<synchronous>, transform_indices = @transform_3, window_bounds = array<i64: 128, 128>}, {pipeline_mode = #tpu.pipeline_mode<synchronous>, transform_indices = @transform_4, window_bounds = array<i64: 1, 128>}, {transform_indices = @transform_5, window_bounds = array<i64: 8, 128>}]} {
    %c0 = arith.constant 0 : index
    %c0_0 = arith.constant 0 : index
    %0 = vector.load %arg1[%c0, %c0_0] : memref<8x32xf32, #tpu.memory_space<vmem>>, vector<8x32xf32>
    %c0_1 = arith.constant 0 : index
    %c0_2 = arith.constant 0 : index
    %1 = vector.load %arg2[%c0_1, %c0_2] : memref<32x128xf32, #tpu.memory_space<vmem>>, vector<32x128xf32>
    %cst = arith.constant dense<0.000000e+00> : vector<8x128xf32>
    %2 = tpu.matmul %0, %1, %cst {dimension_numbers = #tpu.dot_dimension_numbers<[1], [0], [0], [1], [0, 0, 1, 1], [], []>} : vector<8x32xf32>, vector<32x128xf32>, vector<8x128xf32> -> vector<8x128xf32>
    %c0_3 = arith.constant 0 : index
    %c0_4 = arith.constant 0 : index
    %3 = vector.load %arg3[%c0_3, %c0_4] : memref<1x128xf32, #tpu.memory_space<vmem>>, vector<1x128xf32>
    %4 = vector.broadcast %3 : vector<1x128xf32> to vector<8x128xf32>
    %5 = arith.addf %2, %4 : vector<8x128xf32>
    %cst_5 = arith.constant 0.000000e+00 : f32
    %6 = vector.broadcast %cst_5 : f32 to vector<8x128xf32>
    %7 = arith.maximumf %5, %6 : vector<8x128xf32>
    %c0_6 = arith.constant 0 : index
    %c0_7 = arith.constant 0 : index
    %8 = vector.load %arg4[%c0_6, %c0_7] : memref<128x128xf32, #tpu.memory_space<vmem>>, vector<128x128xf32>
    %cst_8 = arith.constant dense<0.000000e+00> : vector<8x128xf32>
    %9 = tpu.matmul %7, %8, %cst_8 {dimension_numbers = #tpu.dot_dimension_numbers<[1], [0], [0], [1], [0, 0, 1, 1], [], []>} : vector<8x128xf32>, vector<128x128xf32>, vector<8x128xf32> -> vector<8x128xf32>
    %c0_9 = arith.constant 0 : index
    %c0_10 = arith.constant 0 : index
    %10 = vector.load %arg5[%c0_9, %c0_10] : memref<1x128xf32, #tpu.memory_space<vmem>>, vector<1x128xf32>
    %11 = vector.broadcast %10 : vector<1x128xf32> to vector<8x128xf32>
    %12 = arith.addf %9, %11 : vector<8x128xf32>
    %cst_11 = arith.constant dense<0xFF800000> : vector<8xf32>
    %13 = vector.multi_reduction <maximumf>, %12, %cst_11 [1] : vector<8x128xf32> to vector<8xf32>
    %14 = vector.shape_cast %13 : vector<8xf32> to vector<8x1xf32>
    %15 = vector.broadcast %14 : vector<8x1xf32> to vector<8x128xf32>
    %16 = arith.subf %12, %15 : vector<8x128xf32>
    %17 = math.exp %16 : vector<8x128xf32>
    %cst_12 = arith.constant dense<0.000000e+00> : vector<8xf32>
    %18 = vector.multi_reduction <add>, %17, %cst_12 [1] : vector<8x128xf32> to vector<8xf32>
    %19 = vector.shape_cast %18 : vector<8xf32> to vector<8x1xf32>
    %20 = math.log %19 : vector<8x1xf32>
    %21 = vector.broadcast %20 : vector<8x1xf32> to vector<8x128xf32>
    %22 = arith.subf %16, %21 : vector<8x128xf32>
    %c0_13 = arith.constant 0 : index
    %c0_14 = arith.constant 0 : index
    %23 = vector.load %arg6[%c0_13, %c0_14] : memref<8x128xf32, #tpu.memory_space<vmem>>, vector<8x128xf32>
    tpu.vector_store %arg6[%c0_13, %c0_14], %22 {strides = array<i32>} : memref<8x128xf32, #tpu.memory_space<vmem>>, vector<8x128xf32>,
    return
  }
  func.func @transform_0(%arg0: i32) -> (i32, i32) {
    %c0_i32 = arith.constant 0 : i32
    %c0_i32_0 = arith.constant 0 : i32
    return %arg0, %c0_i32 : i32, i32
  }
  func.func @transform_1(%arg0: i32) -> (i32, i32) {
    %c0_i32 = arith.constant 0 : i32
    %c0_i32_0 = arith.constant 0 : i32
    %c0_i32_1 = arith.constant 0 : i32
    return %c0_i32, %c0_i32_0 : i32, i32
  }
  func.func @transform_2(%arg0: i32) -> (i32, i32) {
    %c0_i32 = arith.constant 0 : i32
    %c0_i32_0 = arith.constant 0 : i32
    %c0_i32_1 = arith.constant 0 : i32
    return %c0_i32, %c0_i32_0 : i32, i32
  }
  func.func @transform_3(%arg0: i32) -> (i32, i32) {
    %c0_i32 = arith.constant 0 : i32
    %c0_i32_0 = arith.constant 0 : i32
    %c0_i32_1 = arith.constant 0 : i32
    return %c0_i32, %c0_i32_0 : i32, i32
  }
  func.func @transform_4(%arg0: i32) -> (i32, i32) {
    %c0_i32 = arith.constant 0 : i32
    %c0_i32_0 = arith.constant 0 : i32
    %c0_i32_1 = arith.constant 0 : i32
    return %c0_i32, %c0_i32_0 : i32, i32
  }
  func.func @transform_5(%arg0: i32) -> (i32, i32) {
    %c0_i32 = arith.constant 0 : i32
    %c0_i32_0 = arith.constant 0 : i32
    return %arg0, %c0_i32 : i32, i32
  }
}

</mosaic_0001>

<bundles_post_ra>
// kernel: tpu_custom_call.1
= control target key start
LH: loop header
LB: loop body
LE: loop exit
PB: predicated region body
PF: predicated region fallthrough
CT: control target
= control target key end

     0   :  { %10 = vsyncpa [#allocation3], 0  ;;  %s338_s0 = inlined_call_operand.hbm [shape: f32[8,32], index: 0, kind: input, shape index: {}]   ;;  %s339_s1 = inlined_call_operand.hbm [shape: f32[32,128], index: 1, kind: input, shape index: {}]   ;;  %s340_s2 = inlined_call_operand.vmem [shape: f32[1,128], index: 2, kind: input, shape index: {}]   ;;  %s341_s3 = inlined_call_operand.hbm [shape: f32[128,128], index: 3, kind: input, shape index: {}]   ;;  %s342_s4 = inlined_call_operand.vmem [shape: f32[1,128], index: 4, kind: input, shape index: {}]   ;;  %s343_s5 = inlined_call_operand.hbm [shape: f32[8,128], index: 5, kind: output, shape index: {}]  }
   0x1   :  { %11 = vsyncpa [#allocation6], 0  ;;  %s28_s20 = sshll.u32 %s339_s1, 4  ;;  %s29_s20 = int_to_ptr.hbm [resolvable:$true] %s28_s20 }
   0x2   :  { %12 = vsyncpa [#allocation4], 0  ;;  %s284_s21 = smov [#allocation5]   ;;  %s18_s25 = sshll.u32 %s338_s0, 4  ;;  %s19_s25 = int_to_ptr.hbm [resolvable:$true] %s18_s25 }
   0x3   :  { %s30_s22 = sshll.u32 %s284_s21, 4  ;;  %s285_s26 = smov 128   ;;  %s31_s22 = int_to_ptr.vmem [resolvable:$true] %s30_s22 }
   0x4   :  { %s286_s27 = smov 8   ;;  %s287_s28 = smov [#allocation2]  }
   0x5   :  { %36 = dma.hbm_to_vmem [thread:$0]  %s29_s20, 512, %s31_s22, [#allocation6], %s285_s26, %s285_s26, %s286_s27  }
   0x6   :  { %s20_s29 = sshll.u32 %s287_s28, 4  ;;  %s43_s7 = sshll.u32 %s341_s3, 4  ;;  %s21_s29 = int_to_ptr.vmem [resolvable:$true] %s20_s29  ;;  %s44_s7 = int_to_ptr.hbm [resolvable:$true] %s43_s7 }
   0x7   :  { %23 = dma.hbm_to_vmem [thread:$0]  %s19_s25, 128, %s21_s29, [#allocation3]  }
   0x8   :  { %s288_s1 = smov [#allocation7]  }
   0x9   :  { %s45_s8 = sshll.u32 %s288_s1, 4  ;;  %s46_s8 = int_to_ptr.vmem [resolvable:$true] %s45_s8 }
   0xa   :  { %51 = dma.hbm_to_vmem [thread:$0]  %s44_s7, 2048, %s46_s8, [#allocation6], %s285_s26, %s285_s26, %s286_s27  }
   0xb   :  { %278 = dma.done.wait [#allocation3], 128  }
   0xc   :  { %279 = vsyncadd [#allocation3], 4294967168 }
   0xd   :  { %280 = dma.done.wait [#allocation6], 2560  }
   0xe   :  { %281 = vsyncadd [#allocation6], 4294964736  ;;  %v70_v0 = vld [vmem:[#allocation5 + $0x18] sm:$0xff]  ;;  %v69_v1 = vld [vmem:[#allocation5 + $0x10] sm:$0xff]  ;;  %vm75_vm0 = vcmask 261120   ;;  %s158_s14 = sshll.u32 %s343_s5, 4  ;;  %s159_s14 = int_to_ptr.hbm [resolvable:$true] %s158_s14 }
   0xf   :  { %91 = vmatpush.msra.mxu0 %v70_v0  ;;  %v115_v2 = vld [vmem:[#allocation7 + $0x78] sm:$0xff]  ;;  %v68_v3 = vld [vmem:[#allocation5 + $0x8] sm:$0xff]  ;;  %v114_v4 = vld [vmem:[#allocation7 + $0x70] sm:$0xff] }
  0x10   :  { %120 = vmatpush.msra.mxu1 %v115_v2  ;;  %v113_v5 = vld [vmem:[#allocation7 + $0x68] sm:$0xff]  ;;  %v67_v6 = vld [vmem:[#allocation5] sm:$0xff]  ;;  %v66_v7 = vld [vmem:[#allocation2] sm:$0xff] }
  0x11   :  { %92 = vmatpush.msra.mxu0 %v69_v1  ;;  %v112_v8 = vld [vmem:[#allocation7 + $0x60] sm:$0xff]  ;;  %v111_v9 = vld [vmem:[#allocation7 + $0x58] sm:$0xff]  ;;  %v110_v10 = vld [vmem:[#allocation7 + $0x50] sm:$0xff] }
  0x12   :  { %121 = vmatpush.msra.mxu1 %v114_v4  ;;  %v109_v11 = vld [vmem:[#allocation7 + $0x48] sm:$0xff]  ;;  %v108_v12 = vld [vmem:[#allocation7 + $0x40] sm:$0xff]  ;;  %v107_v13 = vld [vmem:[#allocation7 + $0x38] sm:$0xff] }
  0x13   :  { %93 = vmatpush.msra.mxu0 %v68_v3  ;;  %v106_v14 = vld [vmem:[#allocation7 + $0x30] sm:$0xff]  ;;  %v105_v15 = vld [vmem:[#allocation7 + $0x28] sm:$0xff]  ;;  %v104_v16 = vld [vmem:[#allocation7 + $0x20] sm:$0xff] }
  0x14   :  { %122 = vmatpush.msra.mxu1 %v113_v5  ;;  %v103_v17 = vld [vmem:[#allocation7 + $0x18] sm:$0xff]  ;;  %v102_v18 = vld [vmem:[#allocation7 + $0x10] sm:$0xff]  ;;  %v101_v19 = vld [vmem:[#allocation7 + $0x8] sm:$0xff] }
  0x15   :  { %94 = vmatpush.msra.mxu0 %v67_v6  ;;  %v100_v20 = vld [vmem:[#allocation7] sm:$0xff]  ;;  %v176_v21 = vld [vmem:[%s340_s2] ss:$0 sm:$0xff]  ;;  %s289_s2 = smov [#allocation8]  }
  0x16   :  { %169 = vmatmul.msk.f32.vlgmr.msra.gmra.mxu0 %vm75_vm0, %v66_v7  ;;  %123 = vmatpush.msra.mxu1 %v112_v8  ;;  %v177_v25 = vld [vmem:[%s342_s4] ss:$0 sm:$0xff]  ;;  %s156_s11 = sshll.u32 %s289_s2, 4  ;;  %s157_s11 = int_to_ptr.vmem [resolvable:$true] %s156_s11 }
  0x18   :  { %124 = vmatpush.msra.mxu1 %v111_v9 }
  0x1a   :  { %125 = vmatpush.msra.mxu1 %v110_v10 }
  0x1c   :  { %126 = vmatpush.msra.mxu1 %v109_v11 }
  0x1e   :  { %127 = vmatpush.msra.mxu1 %v108_v12 }
  0x20   :  { %128 = vmatpush.msra.mxu1 %v107_v13 }
  0x22   :  { %129 = vmatpush.msra.mxu1 %v106_v14 }
  0x24   :  { %130 = vmatpush.msra.mxu1 %v105_v15 }
  0x26   :  { %131 = vmatpush.msra.mxu1 %v104_v16 }
  0x28   :  { %132 = vmatpush.msra.mxu1 %v103_v17 }
  0x2a   :  { %133 = vmatpush.msra.mxu1 %v102_v18 }
  0x2c   :  { %134 = vmatpush.msra.mxu1 %v101_v19 }
  0x2e   :  { %135 = vmatpush.msra.mxu1 %v100_v20 }
  0x93   :  { %v96_v22 = vpop.f32.mrf.mxu0 }
  0x94   :  { %v97_v23 = vadd.f32 %v176_v21, %v96_v22 }
  0x96   :  { %v99_v24 = vmax.f32 %v97_v23, 0.0 }
  0x98   :  { %136 = vmatmul.f32.vlgmr.msra.gmra.mxu1 %v99_v24 }
 0x115   :  { %v137_v26 = vpop.f32.mrf.mxu1 }
 0x116   :  { %v138_v27 = vadd.f32 %v177_v25, %v137_v26 }
 0x118   :  { %140 = vmax.xlane.f32.xlu0 %v138_v27 }
 0x18b   :  { %v141_v28 = vpop.xlane.xlu0 %140 }
 0x18c   :  { %v142_v29 = vsub.f32 %v138_v27, %v141_v28 }
 0x18e   :  { %v143_v30 = vmul.f32 1.442695, %v142_v29 }
 0x190   :  { %178 = vpow2.f32 %v143_v30 }
 0x196   :  { %v179_v31 = vpop.eup %178 }
 0x197   :  { %145 = vadd.xlane.f32.xlu0 %v179_v31 }
 0x20a   :  { %v146_v32 = vpop.xlane.xlu0 %145 }
 0x20b   :  { %180 = vlog2.f32 %v146_v32 }
 0x211   :  { %v181_v33 = vpop.eup %180 }
 0x212   :  { %v148_v34 = vmul.f32 0.6931472, %v181_v33 }
 0x214   :  { %v149_v35 = vsub.f32 %v142_v29, %v148_v34 }
 0x216   :  { %150 = vst [vmem:[#allocation8] sm:$0xff] %v149_v35 }
 0x217   :  { %161 = dma.vmem_to_hbm [thread:$0]  %s157_s11, 128, %s159_s14, [#allocation4]  }
 0x218   :  { %282 = dma.done.wait [#allocation4], 128  }
 0x219   :  { %283 = vsyncadd [#allocation4], 4294967168 }
 0x21a   :  { %166 = vsyncpa [#allocation3], 1 }
 0x21b   :  { %167 = vsyncpa [#allocation6], 1 }
 0x21c   :  { %168 = vsyncpa [#allocation4], 1 }

// kernel: tpu_custom_call.1
= control target key start
LH: loop header
LB: loop body
LE: loop exit
PB: predicated region body
PF: predicated region fallthrough
CT: control target
= control target key end

     0   :  { %10 = vsyncpa [#allocation3], 0  ;;  %s338_s0 = inlined_call_operand.hbm [shape: f32[8,32], index: 0, kind: input, shape index: {}]   ;;  %s339_s1 = inlined_call_operand.hbm [shape: f32[32,128], index: 1, kind: input, shape index: {}]   ;;  %s340_s2 = inlined_call_operand.vmem [shape: f32[1,128], index: 2, kind: input, shape index: {}]   ;;  %s341_s3 = inlined_call_operand.hbm [shape: f32[128,128], index: 3, kind: input, shape index: {}]   ;;  %s342_s4 = inlined_call_operand.vmem [shape: f32[1,128], index: 4, kind: input, shape index: {}]   ;;  %s343_s5 = inlined_call_operand.hbm [shape: f32[8,128], index: 5, kind: output, shape index: {}]  }
   0x1   :  { %11 = vsyncpa [#allocation6], 0  ;;  %s28_s20 = sshll.u32 %s339_s1, 4  ;;  %s29_s20 = int_to_ptr.hbm [resolvable:$true] %s28_s20 }
   0x2   :  { %12 = vsyncpa [#allocation4], 0  ;;  %s284_s21 = smov [#allocation5]   ;;  %s18_s25 = sshll.u32 %s338_s0, 4  ;;  %s19_s25 = int_to_ptr.hbm [resolvable:$true] %s18_s25 }
   0x3   :  { %s30_s22 = sshll.u32 %s284_s21, 4  ;;  %s285_s26 = smov 128   ;;  %s31_s22 = int_to_ptr.vmem [resolvable:$true] %s30_s22 }
   0x4   :  { %s286_s27 = smov 8   ;;  %s287_s28 = smov [#allocation2]  }
   0x5   :  { %36 = dma.hbm_to_vmem [thread:$0]  %s29_s20, 512, %s31_s22, [#allocation6], %s285_s26, %s285_s26, %s286_s27  }
   0x6   :  { %s20_s29 = sshll.u32 %s287_s28, 4  ;;  %s43_s7 = sshll.u32 %s341_s3, 4  ;;  %s21_s29 = int_to_ptr.vmem [resolvable:$true] %s20_s29  ;;  %s44_s7 = int_to_ptr.hbm [resolvable:$true] %s43_s7 }
   0x7   :  { %23 = dma.hbm_to_vmem [thread:$0]  %s19_s25, 128, %s21_s29, [#allocation3]  }
   0x8   :  { %s288_s1 = smov [#allocation7]  }
   0x9   :  { %s45_s8 = sshll.u32 %s288_s1, 4  ;;  %s46_s8 = int_to_ptr.vmem [resolvable:$true] %s45_s8 }
   0xa   :  { %51 = dma.hbm_to_vmem [thread:$0]  %s44_s7, 2048, %s46_s8, [#allocation6], %s285_s26, %s285_s26, %s286_s27  }
   0xb   :  { %278 = dma.done.wait [#allocation3], 128  }
   0xc   :  { %279 = vsyncadd [#allocation3], 4294967168 }
   0xd   :  { %280 = dma.done.wait [#allocation6], 2560  }
   0xe   :  { %281 = vsyncadd [#allocation6], 4294964736  ;;  %v70_v0 = vld [vmem:[#allocation5 + $0x18] sm:$0xff]  ;;  %v69_v1 = vld [vmem:[#allocation5 + $0x10] sm:$0xff]  ;;  %vm75_vm0 = vcmask 261120   ;;  %s158_s14 = sshll.u32 %s343_s5, 4  ;;  %s159_s14 = int_to_ptr.hbm [resolvable:$true] %s158_s14 }
   0xf   :  { %91 = vmatpush.msra.mxu0 %v70_v0  ;;  %v115_v2 = vld [vmem:[#allocation7 + $0x78] sm:$0xff]  ;;  %v68_v3 = vld [vmem:[#allocation5 + $0x8] sm:$0xff]  ;;  %v114_v4 = vld [vmem:[#allocation7 + $0x70] sm:$0xff] }
  0x10   :  { %120 = vmatpush.msra.mxu1 %v115_v2  ;;  %v113_v5 = vld [vmem:[#allocation7 + $0x68] sm:$0xff]  ;;  %v67_v6 = vld [vmem:[#allocation5] sm:$0xff]  ;;  %v66_v7 = vld [vmem:[#allocation2] sm:$0xff] }
  0x11   :  { %92 = vmatpush.msra.mxu0 %v69_v1  ;;  %v112_v8 = vld [vmem:[#allocation7 + $0x60] sm:$0xff]  ;;  %v111_v9 = vld [vmem:[#allocation7 + $0x58] sm:$0xff]  ;;  %v110_v10 = vld [vmem:[#allocation7 + $0x50] sm:$0xff] }
  0x12   :  { %121 = vmatpush.msra.mxu1 %v114_v4  ;;  %v109_v11 = vld [vmem:[#allocation7 + $0x48] sm:$0xff]  ;;  %v108_v12 = vld [vmem:[#allocation7 + $0x40] sm:$0xff]  ;;  %v107_v13 = vld [vmem:[#allocation7 + $0x38] sm:$0xff] }
  0x13   :  { %93 = vmatpush.msra.mxu0 %v68_v3  ;;  %v106_v14 = vld [vmem:[#allocation7 + $0x30] sm:$0xff]  ;;  %v105_v15 = vld [vmem:[#allocation7 + $0x28] sm:$0xff]  ;;  %v104_v16 = vld [vmem:[#allocation7 + $0x20] sm:$0xff] }
  0x14   :  { %122 = vmatpush.msra.mxu1 %v113_v5  ;;  %v103_v17 = vld [vmem:[#allocation7 + $0x18] sm:$0xff]  ;;  %v102_v18 = vld [vmem:[#allocation7 + $0x10] sm:$0xff]  ;;  %v101_v19 = vld [vmem:[#allocation7 + $0x8] sm:$0xff] }
  0x15   :  { %94 = vmatpush.msra.mxu0 %v67_v6  ;;  %v100_v20 = vld [vmem:[#allocation7] sm:$0xff]  ;;  %v176_v21 = vld [vmem:[%s340_s2] ss:$0 sm:$0xff]  ;;  %s289_s2 = smov [#allocation8]  }
  0x16   :  { %169 = vmatmul.msk.f32.vlgmr.msra.gmra.mxu0 %vm75_vm0, %v66_v7  ;;  %123 = vmatpush.msra.mxu1 %v112_v8  ;;  %v177_v25 = vld [vmem:[%s342_s4] ss:$0 sm:$0xff]  ;;  %s156_s11 = sshll.u32 %s289_s2, 4  ;;  %s157_s11 = int_to_ptr.vmem [resolvable:$true] %s156_s11 }
  0x18   :  { %124 = vmatpush.msra.mxu1 %v111_v9 }
  0x1a   :  { %125 = vmatpush.msra.mxu1 %v110_v10 }
  0x1c   :  { %126 = vmatpush.msra.mxu1 %v109_v11 }
  0x1e   :  { %127 = vmatpush.msra.mxu1 %v108_v12 }
  0x20   :  { %128 = vmatpush.msra.mxu1 %v107_v13 }
  0x22   :  { %129 = vmatpush.msra.mxu1 %v106_v14 }
  0x24   :  { %130 = vmatpush.msra.mxu1 %v105_v15 }
  0x26   :  { %131 = vmatpush.msra.mxu1 %v104_v16 }
  0x28   :  { %132 = vmatpush.msra.mxu1 %v103_v17 }
  0x2a   :  { %133 = vmatpush.msra.mxu1 %v102_v18 }
  0x2c   :  { %134 = vmatpush.msra.mxu1 %v101_v19 }
  0x2e   :  { %135 = vmatpush.msra.mxu1 %v100_v20 }
  0x93   :  { %v96_v22 = vpop.f32.mrf.mxu0 }
  0x94   :  { %v97_v23 = vadd.f32 %v176_v21, %v96_v22 }
  0x96   :  { %v99_v24 = vmax.f32 %v97_v23, 0.0 }
  0x98   :  { %136 = vmatmul.f32.vlgmr.msra.gmra.mxu1 %v99_v24 }
 0x115   :  { %v137_v26 = vpop.f32.mrf.mxu1 }
 0x116   :  { %v138_v27 = vadd.f32 %v177_v25, %v137_v26 }
 0x118   :  { %140 = vmax.xlane.f32.xlu0 %v138_v27 }
 0x18b   :  { %v141_v28 = vpop.xlane.xlu0 %140 }
 0x18c   :  { %v142_v29 = vsub.f32 %v138_v27, %v141_v28 }
 0x18e   :  { %v143_v30 = vmul.f32 1.442695, %v142_v29 }
 0x190   :  { %178 = vpow2.f32 %v143_v30 }
 0x196   :  { %v179_v31 = vpop.eup %178 }
 0x197   :  { %145 = vadd.xlane.f32.xlu0 %v179_v31 }
 0x20a   :  { %v146_v32 = vpop.xlane.xlu0 %145 }
 0x20b   :  { %180 = vlog2.f32 %v146_v32 }
 0x211   :  { %v181_v33 = vpop.eup %180 }
 0x212   :  { %v148_v34 = vmul.f32 0.6931472, %v181_v33 }
 0x214   :  { %v149_v35 = vsub.f32 %v142_v29, %v148_v34 }
 0x216   :  { %150 = vst [vmem:[#allocation8] sm:$0xff] %v149_v35 }
 0x217   :  { %161 = dma.vmem_to_hbm [thread:$0]  %s157_s11, 128, %s159_s14, [#allocation4]  }
 0x218   :  { %282 = dma.done.wait [#allocation4], 128  }
 0x219   :  { %283 = vsyncadd [#allocation4], 4294967168 }
 0x21a   :  { %166 = vsyncpa [#allocation3], 1 }
 0x21b   :  { %167 = vsyncpa [#allocation6], 1 }
 0x21c   :  { %168 = vsyncpa [#allocation4], 1 }

</bundles_post_ra>
